<compile_context>
chip_gen: v5e
topology: v5e:2x2
jax: 0.10.0
libtpu: 0.0.40
codegen_flags: <defaults>
</compile_context>

<pallas_src>
import jax
import jax.numpy as jnp
from jax.experimental import pallas as pl
from jax.experimental.pallas import tpu as pltpu


def _gelu_chain(v):
    # Exactly mirrors v2..v10 / w2..w10 of the PyTorch forward.
    a = v * 0.5
    b = v * v
    c = b * v
    d = c * 0.044715
    e = v + d
    f = e * 0.7978845608028654
    g = jnp.tanh(f)
    h = g + 1.0
    return a * h


def fused_kernel(p_ref, w1_ref, b1_ref, w2_ref, b2_ref, o_ref):
    # p_ref : (650, TM)  im2col patches (taps on sublanes, output pixels on lanes)
    # w1_ref: (13, 650)  block-diagonal grouped-conv weights (row g nonzero on [g*50, (g+1)*50))
    # b1_ref: (13, 1)
    # w2_ref: (11, 13)   1x1-conv weights
    # b2_ref: (11, 1)
    # o_ref : (11, TM)
    # Grouped conv as one MXU matmul (block-diagonal weight does the per-group reduce).
    v1 = jnp.dot(w1_ref[...], p_ref[...],
                 preferred_element_type=jnp.float32) + b1_ref[...]      # (13, TM)
    g1 = _gelu_chain(v1)                                                # lane-dense

    # 1x1 conv == matmul on the MXU.
    w_out = jnp.dot(w2_ref[...], g1,
                    preferred_element_type=jnp.float32) + b2_ref[...]   # (11, TM)
    o_ref[...] = _gelu_chain(w_out)


def _extract_patches_t(x, K=5, stride=2, pad=1):
    """x: (N, C, H, W) -> p_T (C*K*K, N*Ho*Wo), row order (c, kh*K + kw)."""
    N, C, H, W = x.shape
    # Transpose the small input BEFORE the 25x tap blow-up so the expanded
    # patch tensor is already in kernel order (no post-transpose of 25x data).
    xt = jnp.transpose(x, (1, 0, 2, 3))                                 # (C, N, H, W)
    xp = jnp.pad(xt, ((0, 0), (0, 0), (pad, pad), (pad, pad)))
    Ho = (H + 2 * pad - K) // stride + 1
    Wo = (W + 2 * pad - K) // stride + 1
    taps = []
    for kh in range(K):
        for kw in range(K):
            taps.append(xp[:, :,
                           kh:kh + stride * (Ho - 1) + 1:stride,
                           kw:kw + stride * (Wo - 1) + 1:stride])       # (C, N, Ho, Wo)
    p = jnp.stack(taps, axis=1)                                         # (C, 25, N, Ho, Wo)
    return p.reshape(C * K * K, N * Ho * Wo), Ho, Wo


def _pick_tm(M):
    # Biggest lane tile <= 512 that still leaves >= 2 grid steps (megacore on v7x).
    for tm in (512, 256, 128):
        if M >= 2 * tm:
            return tm
    return 128


@jax.jit
def model_forward(x, w1, b1, w2, b2):
    """x: (N, 26, H, W) f32.  Returns (N, 11, Ho, Wo) f32 (NCHW, like PyTorch)."""
    N = x.shape[0]
    p_t, Ho, Wo = _extract_patches_t(x, K=5, stride=2, pad=1)           # (650, M)
    M = N * Ho * Wo
    TM = _pick_tm(M)
    Mpad = ((M + TM - 1) // TM) * TM
    p_t = jnp.pad(p_t, ((0, 0), (0, Mpad - M)))                         # (650, Mpad)

    # Block-diagonal grouped-conv weight, already transposed: (13, 650).
    # Column index k = g*50 + ci*25 + tap matches patch row c*25 + tap with c = g*2+ci.
    w1_flat = w1.reshape(13, 50)                                        # (13, 2*5*5)
    w1_bd_t = (jnp.eye(13, dtype=w1_flat.dtype)[:, :, None]
               * w1_flat[None, :, :]).reshape(13, 650)
    b1_col = b1.reshape(13, 1)
    w2_mat = w2.reshape(11, 13)                                         # OIHW (11,13,1,1) -> (11,13)
    b2_col = b2.reshape(11, 1)

    out_t = pl.pallas_call(
        fused_kernel,
        out_shape=jax.ShapeDtypeStruct((11, Mpad), jnp.float32),
        grid=(Mpad // TM,),
        in_specs=[
            pl.BlockSpec((650, TM), lambda i: (0, i)),   # patches: pixels on lanes
            pl.BlockSpec((13, 650), lambda i: (0, 0)),   # resident weights (constant index_map)
            pl.BlockSpec((13, 1), lambda i: (0, 0)),
            pl.BlockSpec((11, 13), lambda i: (0, 0)),
            pl.BlockSpec((11, 1), lambda i: (0, 0)),
        ],
        out_specs=pl.BlockSpec((11, TM), lambda i: (0, i)),
        compiler_params=pltpu.CompilerParams(
            dimension_semantics=("parallel",),
            vmem_limit_bytes=64 * 1024 * 1024,
        ),
    )(p_t, w1_bd_t, b1_col, w2_mat, b2_col)

    out = out_t[:, :M].reshape(11, N, Ho, Wo)                           # drop padded columns first
    return jnp.transpose(out, (1, 0, 2, 3))                             # NCHW


def reference_forward(x, w1, b1, w2, b2):
    """Pure-JAX reference (lax.conv) for correctness checking."""
    dn = ("NCHW", "OIHW", "NCHW")
    v1 = jax.lax.conv_general_dilated(
        x, w1, (2, 2), [(1, 1), (1, 1)], dimension_numbers=dn,
        feature_group_count=13,
        precision=jax.lax.Precision.HIGHEST) + b1[None, :, None, None]
    g1 = _gelu_chain(v1)
    w_out = jax.lax.conv_general_dilated(
        g1, w2, (1, 1), [(0, 0), (0, 0)], dimension_numbers=dn,
        precision=jax.lax.Precision.HIGHEST) + b2[None, :, None, None]
    return _gelu_chain(w_out)


if __name__ == "__main__":
    key = jax.random.PRNGKey(0)
    kx, k1, k2, k3, k4 = jax.random.split(key, 5)

    # Small-shape example consistent with the module (channels fixed at 26 by the conv).
    N, C, H, W = 2, 26, 16, 16
    x = jax.random.normal(kx, (N, C, H, W), dtype=jnp.float32)

    # Deterministic parameter init (shapes from the PyTorch __init__).
    w1 = jax.random.normal(k1, (13, 2, 5, 5), dtype=jnp.float32) * 0.1   # groups=13 -> 2 cin/group
    b1 = jax.random.normal(k2, (13,), dtype=jnp.float32) * 0.1
    w2 = jax.random.normal(k3, (11, 13, 1, 1), dtype=jnp.float32) * 0.1
    b2 = jax.random.normal(k4, (11,), dtype=jnp.float32) * 0.1

    out = jax.block_until_ready(model_forward(x, w1, b1, w2, b2))
    ref = jax.block_until_ready(reference_forward(x, w1, b1, w2, b2))

    assert out.shape == ref.shape == (N, 11, 7, 7), (out.shape, ref.shape)
    max_err = float(jnp.max(jnp.abs(out - ref)))
    assert jnp.allclose(out, ref, rtol=2e-3, atol=2e-3), max_err

    print("KERNEL_OK")
</pallas_src>

<mosaic_0001>
module attributes {stable_mosaic.version = 11 : i64} {
  func.func @fused_kernel(%arg0: i32, %arg1: memref<650x128xf32, #tpu.memory_space<vmem>>, %arg2: memref<13x650xf32, #tpu.memory_space<vmem>>, %arg3: memref<13x1xf32, #tpu.memory_space<vmem>>, %arg4: memref<11x13xf32, #tpu.memory_space<vmem>>, %arg5: memref<11x1xf32, #tpu.memory_space<vmem>>, %arg6: memref<11x128xf32, #tpu.memory_space<vmem>>) attributes {dimension_semantics = [#tpu.dimension_semantics<parallel>], iteration_bounds = array<i64: 1>, scalar_prefetch = 0 : i64, scratch_operands = 0 : i64, tpu.core_type = #tpu.core_type<tc>, window_params = [{transform_indices = @transform_0, window_bounds = array<i64: 650, 128>}, {pipeline_mode = #tpu.pipeline_mode<synchronous>, transform_indices = @transform_1, window_bounds = array<i64: 13, 650>}, {pipeline_mode = #tpu.pipeline_mode<synchronous>, transform_indices = @transform_2, window_bounds = array<i64: 13, 1>}, {pipeline_mode = #tpu.pipeline_mode<synchronous>, transform_indices = @transform_3, window_bounds = array<i64: 11, 13>}, {pipeline_mode = #tpu.pipeline_mode<synchronous>, transform_indices = @transform_4, window_bounds = array<i64: 11, 1>}, {transform_indices = @transform_5, window_bounds = array<i64: 11, 128>}]} {
    %c0 = arith.constant 0 : index
    %c0_0 = arith.constant 0 : index
    %0 = vector.load %arg2[%c0, %c0_0] : memref<13x650xf32, #tpu.memory_space<vmem>>, vector<13x650xf32>
    %c0_1 = arith.constant 0 : index
    %c0_2 = arith.constant 0 : index
    %1 = vector.load %arg1[%c0_1, %c0_2] : memref<650x128xf32, #tpu.memory_space<vmem>>, vector<650x128xf32>
    %cst = arith.constant dense<0.000000e+00> : vector<13x128xf32>
    %2 = tpu.matmul %0, %1, %cst {dimension_numbers = #tpu.dot_dimension_numbers<[1], [0], [0], [1], [0, 0, 1, 1], [], []>} : vector<13x650xf32>, vector<650x128xf32>, vector<13x128xf32> -> vector<13x128xf32>
    %c0_3 = arith.constant 0 : index
    %c0_4 = arith.constant 0 : index
    %3 = vector.load %arg3[%c0_3, %c0_4] : memref<13x1xf32, #tpu.memory_space<vmem>>, vector<13x1xf32>
    %4 = vector.broadcast %3 : vector<13x1xf32> to vector<13x128xf32>
    %5 = arith.addf %2, %4 : vector<13x128xf32>
    %cst_5 = arith.constant 5.000000e-01 : f32
    %6 = vector.broadcast %cst_5 : f32 to vector<13x128xf32>
    %7 = arith.mulf %5, %6 : vector<13x128xf32>
    %8 = arith.mulf %5, %5 : vector<13x128xf32>
    %9 = arith.mulf %8, %5 : vector<13x128xf32>
    %cst_6 = arith.constant 4.471500e-02 : f32
    %10 = vector.broadcast %cst_6 : f32 to vector<13x128xf32>
    %11 = arith.mulf %9, %10 : vector<13x128xf32>
    %12 = arith.addf %5, %11 : vector<13x128xf32>
    %cst_7 = arith.constant 0.797884583 : f32
    %13 = vector.broadcast %cst_7 : f32 to vector<13x128xf32>
    %14 = arith.mulf %12, %13 : vector<13x128xf32>
    %15 = math.tanh %14 : vector<13x128xf32>
    %cst_8 = arith.constant 1.000000e+00 : f32
    %16 = vector.broadcast %cst_8 : f32 to vector<13x128xf32>
    %17 = arith.addf %15, %16 : vector<13x128xf32>
    %18 = arith.mulf %7, %17 : vector<13x128xf32>
    %c0_9 = arith.constant 0 : index
    %c0_10 = arith.constant 0 : index
    %19 = vector.load %arg4[%c0_9, %c0_10] : memref<11x13xf32, #tpu.memory_space<vmem>>, vector<11x13xf32>
    %cst_11 = arith.constant dense<0.000000e+00> : vector<11x128xf32>
    %20 = tpu.matmul %19, %18, %cst_11 {dimension_numbers = #tpu.dot_dimension_numbers<[1], [0], [0], [1], [0, 0, 1, 1], [], []>} : vector<11x13xf32>, vector<13x128xf32>, vector<11x128xf32> -> vector<11x128xf32>
    %c0_12 = arith.constant 0 : index
    %c0_13 = arith.constant 0 : index
    %21 = vector.load %arg5[%c0_12, %c0_13] : memref<11x1xf32, #tpu.memory_space<vmem>>, vector<11x1xf32>
    %22 = vector.broadcast %21 : vector<11x1xf32> to vector<11x128xf32>
    %23 = arith.addf %20, %22 : vector<11x128xf32>
    %cst_14 = arith.constant 5.000000e-01 : f32
    %24 = vector.broadcast %cst_14 : f32 to vector<11x128xf32>
    %25 = arith.mulf %23, %24 : vector<11x128xf32>
    %26 = arith.mulf %23, %23 : vector<11x128xf32>
    %27 = arith.mulf %26, %23 : vector<11x128xf32>
    %cst_15 = arith.constant 4.471500e-02 : f32
    %28 = vector.broadcast %cst_15 : f32 to vector<11x128xf32>
    %29 = arith.mulf %27, %28 : vector<11x128xf32>
    %30 = arith.addf %23, %29 : vector<11x128xf32>
    %cst_16 = arith.constant 0.797884583 : f32
    %31 = vector.broadcast %cst_16 : f32 to vector<11x128xf32>
    %32 = arith.mulf %30, %31 : vector<11x128xf32>
    %33 = math.tanh %32 : vector<11x128xf32>
    %cst_17 = arith.constant 1.000000e+00 : f32
    %34 = vector.broadcast %cst_17 : f32 to vector<11x128xf32>
    %35 = arith.addf %33, %34 : vector<11x128xf32>
    %36 = arith.mulf %25, %35 : vector<11x128xf32>
    %c0_18 = arith.constant 0 : index
    %c0_19 = arith.constant 0 : index
    %37 = vector.load %arg6[%c0_18, %c0_19] : memref<11x128xf32, #tpu.memory_space<vmem>>, vector<11x128xf32>
    tpu.vector_store %arg6[%c0_18, %c0_19], %36 {strides = array<i32>} : memref<11x128xf32, #tpu.memory_space<vmem>>, vector<11x128xf32>,
    return
  }
  func.func @transform_0(%arg0: i32) -> (i32, i32) {
    %c0_i32 = arith.constant 0 : i32
    %c0_i32_0 = arith.constant 0 : i32
    return %c0_i32, %arg0 : i32, i32
  }
  func.func @transform_1(%arg0: i32) -> (i32, i32) {
    %c0_i32 = arith.constant 0 : i32
    %c0_i32_0 = arith.constant 0 : i32
    %c0_i32_1 = arith.constant 0 : i32
    return %c0_i32, %c0_i32_0 : i32, i32
  }
  func.func @transform_2(%arg0: i32) -> (i32, i32) {
    %c0_i32 = arith.constant 0 : i32
    %c0_i32_0 = arith.constant 0 : i32
    %c0_i32_1 = arith.constant 0 : i32
    return %c0_i32, %c0_i32_0 : i32, i32
  }
  func.func @transform_3(%arg0: i32) -> (i32, i32) {
    %c0_i32 = arith.constant 0 : i32
    %c0_i32_0 = arith.constant 0 : i32
    %c0_i32_1 = arith.constant 0 : i32
    return %c0_i32, %c0_i32_0 : i32, i32
  }
  func.func @transform_4(%arg0: i32) -> (i32, i32) {
    %c0_i32 = arith.constant 0 : i32
    %c0_i32_0 = arith.constant 0 : i32
    %c0_i32_1 = arith.constant 0 : i32
    return %c0_i32, %c0_i32_0 : i32, i32
  }
  func.func @transform_5(%arg0: i32) -> (i32, i32) {
    %c0_i32 = arith.constant 0 : i32
    %c0_i32_0 = arith.constant 0 : i32
    return %c0_i32, %arg0 : i32, i32
  }
}

</mosaic_0001>

<bundles_post_ra>
// kernel: model_forward.1
= control target key start
LH: loop header
LB: loop body
LE: loop exit
PB: predicated region body
PF: predicated region fallthrough
CT: control target
= control target key end

     0   :  { %vm133_vm0 = vcmask 1041408   ;;  %vm126_vm1 = vcmask 80896   ;;  %vm314_vm2 = vcmask 1044480   ;;  %vm307_vm3 = vcmask 105472   ;;  %s735_s0 = inlined_call_operand.vmem [shape: f32[650,128], index: 0, kind: input, shape index: {}]   ;;  %s736_s1 = inlined_call_operand.vmem [shape: f32[13,650], index: 1, kind: input, shape index: {}]   ;;  %s737_s2 = inlined_call_operand.vmem [shape: f32[13,1], index: 2, kind: input, shape index: {}]   ;;  %s738_s4 = inlined_call_operand.vmem [shape: f32[11,1], index: 4, kind: input, shape index: {}]   ;;  %s739_s3 = inlined_call_operand.vmem [shape: f32[11,13], index: 3, kind: input, shape index: {}]   ;;  %s740_s5 = inlined_call_operand.vmem [shape: f32[11,128], index: 5, kind: output, shape index: {}]  }
   0x1   :  { %v47_v0 = vld [vmem:[%s735_s0 + $0x78] sm:$0xff]  ;;  %v46_v2 = vld [vmem:[%s735_s0 + $0x70] sm:$0xff]  ;;  %v45_v4 = vld [vmem:[%s735_s0 + $0x68] sm:$0xff] }
   0x2   :  { %v95_v1 = vld [vmem:[%s735_s0 + $0x1f8] sm:$0xff]  ;;  %137 = vmatpush.msra.mxu0 %v47_v0  ;;  %v94_v3 = vld [vmem:[%s735_s0 + $0x1f0] sm:$0xff]  ;;  %v93_v5 = vld [vmem:[%s735_s0 + $0x1e8] sm:$0xff] }
   0x3   :  { %206 = vmatpush.msra.mxu3 %v95_v1  ;;  %v44_v6 = vld [vmem:[%s735_s0 + $0x60] sm:$0xff]  ;;  %v79_v8 = vld [vmem:[%s735_s0 + $0x178] sm:$0xff]  ;;  %v78_v9 = vld [vmem:[%s735_s0 + $0x170] sm:$0xff] }
   0x4   :  { %138 = vmatpush.msra.mxu0 %v46_v2  ;;  %v92_v7 = vld [vmem:[%s735_s0 + $0x1e0] sm:$0xff]  ;;  %v43_v10 = vld [vmem:[%s735_s0 + $0x58] sm:$0xff]  ;;  %183 = vmatpush.msra.mxu2 %v79_v8  ;;  %v77_v13 = vld [vmem:[%s735_s0 + $0x168] sm:$0xff] }
   0x5   :  { %207 = vmatpush.msra.mxu3 %v94_v3  ;;  %v91_v11 = vld [vmem:[%s735_s0 + $0x1d8] sm:$0xff]  ;;  %v62_v14 = vld [vmem:[%s735_s0 + $0xf0] sm:$0xff]  ;;  %v76_v17 = vld [vmem:[%s735_s0 + $0x160] sm:$0xff] }
   0x6   :  { %139 = vmatpush.msra.mxu0 %v45_v4  ;;  %v63_v12 = vld [vmem:[%s735_s0 + $0xf8] sm:$0xff]  ;;  %v42_v15 = vld [vmem:[%s735_s0 + $0x50] sm:$0xff]  ;;  %184 = vmatpush.msra.mxu2 %v78_v9  ;;  %v61_v18 = vld [vmem:[%s735_s0 + $0xe8] sm:$0xff] }
   0x7   :  { %208 = vmatpush.msra.mxu3 %v93_v5  ;;  %v90_v16 = vld [vmem:[%s735_s0 + $0x1d0] sm:$0xff]  ;;  %160 = vmatpush.msra.mxu1 %v63_v12  ;;  %v41_v19 = vld [vmem:[%s735_s0 + $0x48] sm:$0xff]  ;;  %v75_v21 = vld [vmem:[%s735_s0 + $0x158] sm:$0xff] }
   0x8   :  { %140 = vmatpush.msra.mxu0 %v44_v6  ;;  %v89_v20 = vld [vmem:[%s735_s0 + $0x1c8] sm:$0xff]  ;;  %185 = vmatpush.msra.mxu2 %v77_v13  ;;  %v60_v22 = vld [vmem:[%s735_s0 + $0xe0] sm:$0xff]  ;;  %v74_v25 = vld [vmem:[%s735_s0 + $0x150] sm:$0xff] }
   0x9   :  { %209 = vmatpush.msra.mxu3 %v92_v7  ;;  %161 = vmatpush.msra.mxu1 %v62_v14  ;;  %v40_v23 = vld [vmem:[%s735_s0 + $0x40] sm:$0xff]  ;;  %v59_v26 = vld [vmem:[%s735_s0 + $0xd8] sm:$0xff]  ;;  %v73_v29 = vld [vmem:[%s735_s0 + $0x148] sm:$0xff]  ;;  %v398_v14 = vmov 0  }
   0xa   :  { %141 = vmatpush.msra.mxu0 %v43_v10  ;;  %v88_v24 = vld [vmem:[%s735_s0 + $0x1c0] sm:$0xff]  ;;  %186 = vmatpush.msra.mxu2 %v76_v17  ;;  %v39_v27 = vld [vmem:[%s735_s0 + $0x38] sm:$0xff]  ;;  %v58_v30 = vld [vmem:[%s735_s0 + $0xd0] sm:$0xff] }
   0xb   :  { %210 = vmatpush.msra.mxu3 %v91_v11  ;;  %162 = vmatpush.msra.mxu1 %v61_v18  ;;  %v87_v28 = vld [vmem:[%s735_s0 + $0x1b8] sm:$0xff]  ;;  %v38_v31 = vld [vmem:[%s735_s0 + $0x30] sm:$0xff]  ;;  %v72_v33 = vld [vmem:[%s735_s0 + $0x140] sm:$0xff] }
   0xc   :  { %142 = vmatpush.msra.mxu0 %v42_v15  ;;  %187 = vmatpush.msra.mxu2 %v75_v21  ;;  %v86_v32 = vld [vmem:[%s735_s0 + $0x1b0] sm:$0xff]  ;;  %v57_v34 = vld [vmem:[%s735_s0 + $0xc8] sm:$0xff]  ;;  %v71_v37 = vld [vmem:[%s735_s0 + $0x138] sm:$0xff] }
   0xd   :  { %211 = vmatpush.msra.mxu3 %v90_v16  ;;  %163 = vmatpush.msra.mxu1 %v60_v22  ;;  %v37_v35 = vld [vmem:[%s735_s0 + $0x28] sm:$0xff]  ;;  %v56_v38 = vld [vmem:[%s735_s0 + $0xc0] sm:$0xff]  ;;  %v70_v41 = vld [vmem:[%s735_s0 + $0x130] sm:$0xff] }
   0xe   :  { %143 = vmatpush.msra.mxu0 %v41_v19  ;;  %188 = vmatpush.msra.mxu2 %v74_v25  ;;  %v85_v36 = vld [vmem:[%s735_s0 + $0x1a8] sm:$0xff]  ;;  %v36_v39 = vld [vmem:[%s735_s0 + $0x20] sm:$0xff]  ;;  %v55_v42 = vld [vmem:[%s735_s0 + $0xb8] sm:$0xff] }
   0xf   :  { %212 = vmatpush.msra.mxu3 %v89_v20  ;;  %164 = vmatpush.msra.mxu1 %v59_v26  ;;  %v84_v40 = vld [vmem:[%s735_s0 + $0x1a0] sm:$0xff]  ;;  %v35_v43 = vld [vmem:[%s735_s0 + $0x18] sm:$0xff]  ;;  %v69_v45 = vld [vmem:[%s735_s0 + $0x128] sm:$0xff] }
  0x10   :  { %144 = vmatpush.msra.mxu0 %v40_v23  ;;  %189 = vmatpush.msra.mxu2 %v73_v29  ;;  %v83_v44 = vld [vmem:[%s735_s0 + $0x198] sm:$0xff]  ;;  %v54_v46 = vld [vmem:[%s735_s0 + $0xb0] sm:$0xff]  ;;  %v68_v49 = vld [vmem:[%s735_s0 + $0x120] sm:$0xff] }
  0x11   :  { %213 = vmatpush.msra.mxu3 %v88_v24  ;;  %165 = vmatpush.msra.mxu1 %v58_v30  ;;  %v34_v47 = vld [vmem:[%s735_s0 + $0x10] sm:$0xff]  ;;  %v53_v50 = vld [vmem:[%s735_s0 + $0xa8] sm:$0xff]  ;;  %v67_v53 = vld [vmem:[%s735_s0 + $0x118] sm:$0xff] }
  0x12   :  { %145 = vmatpush.msra.mxu0 %v39_v27  ;;  %190 = vmatpush.msra.mxu2 %v72_v33  ;;  %v82_v48 = vld [vmem:[%s735_s0 + $0x190] sm:$0xff]  ;;  %v33_v51 = vld [vmem:[%s735_s0 + $0x8] sm:$0xff]  ;;  %v52_v54 = vld [vmem:[%s735_s0 + $0xa0] sm:$0xff] }
  0x13   :  { %214 = vmatpush.msra.mxu3 %v87_v28  ;;  %166 = vmatpush.msra.mxu1 %v57_v34  ;;  %v81_v52 = vld [vmem:[%s735_s0 + $0x188] sm:$0xff]  ;;  %v32_v55 = vld [vmem:[%s735_s0] sm:$0xff]  ;;  %v111_v57 = vld [vmem:[%s735_s0 + $0x278] sm:$0xff] }
  0x14   :  { %146 = vmatpush.msra.mxu0 %v38_v31  ;;  %191 = vmatpush.msra.mxu2 %v71_v37  ;;  %v80_v56 = vld [vmem:[%s735_s0 + $0x180] sm:$0xff]  ;;  %v66_v58 = vld [vmem:[%s735_s0 + $0x110] sm:$0xff]  ;;  %v51_v59 = vld [vmem:[%s735_s0 + $0x98] sm:$0xff] }
  0x15   :  { %215 = vmatpush.msra.mxu3 %v86_v32  ;;  %167 = vmatpush.msra.mxu1 %v56_v38  ;;  %v110_v60 = vld [vmem:[%s735_s0 + $0x270] sm:$0xff]  ;;  %v65_v61 = vld [vmem:[%s735_s0 + $0x108] sm:$0xff]  ;;  %v64_v0 = vld [vmem:[%s735_s0 + $0x100] sm:$0xff] }
  0x16   :  { %147 = vmatpush.msra.mxu0 %v37_v35  ;;  %192 = vmatpush.msra.mxu2 %v70_v41  ;;  %v50_v62 = vld [vmem:[%s735_s0 + $0x90] sm:$0xff]  ;;  %v109_v63 = vld [vmem:[%s735_s0 + $0x268] sm:$0xff]  ;;  %v108_v2 = vld [vmem:[%s735_s0 + $0x260] sm:$0xff] }
  0x17   :  { %216 = vmatpush.msra.mxu3 %v85_v36  ;;  %168 = vmatpush.msra.mxu1 %v55_v42  ;;  %v49_v1 = vld [vmem:[%s735_s0 + $0x88] sm:$0xff]  ;;  %v22_v3 = vld [vmem:[%s736_s1 + $0x10] sm:$0xff]  ;;  %v20_v4 = vld [vmem:[%s736_s1] sm:$0xff] }
  0x18   :  { %148 = vmatpush.msra.mxu0 %v36_v39  ;;  %193 = vmatpush.msra.mxu2 %v69_v45  ;;  %v107_v5 = vld [vmem:[%s735_s0 + $0x258] sm:$0xff]  ;;  %v48_v7 = vld [vmem:[%s735_s0 + $0x80] sm:$0xff]  ;;  %v106_v8 = vld [vmem:[%s735_s0 + $0x250] sm:$0xff] }
  0x19   :  { %217 = vmatpush.msra.mxu3 %v84_v40  ;;  %169 = vmatpush.msra.mxu1 %v54_v46  ;;  %v23_v6 = vld [vmem:[%s736_s1 + $0x18] sm:$0xff]  ;;  %v21_v9 = vld [vmem:[%s736_s1 + $0x8] sm:$0xff]  ;;  %v104_v13 = vld [vmem:[%s735_s0 + $0x240] sm:$0xff] }
  0x1a   :  { %149 = vmatpush.msra.mxu0 %v35_v43  ;;  %194 = vmatpush.msra.mxu2 %v68_v49  ;;  %v105_v10 = vld [vmem:[%s735_s0 + $0x248] sm:$0xff]  ;;  %v28_v15 = vld [vmem:[%s736_s1 + $0x40] sm:$0x1f]  ;;  %v26_v16 = vld [vmem:[%s736_s1 + $0x30] sm:$0x1f] }
  0x1b   :  { %218 = vmatpush.msra.mxu3 %v83_v44  ;;  %170 = vmatpush.msra.mxu1 %v53_v50  ;;  %v115_v11 = vld [vmem:[%s737_s2 + $0x8] sm:$0x1f]  ;;  %v103_v17 = vld [vmem:[%s735_s0 + $0x238] sm:$0xff]  ;;  %v112_v19 = vld [vmem:[%s735_s0 + $0x280] sm:$0xff] }
  0x1c   :  { %150 = vmatpush.msra.mxu0 %v34_v47  ;;  %195 = vmatpush.msra.mxu2 %v67_v53  ;;  %v113_v12 = vld [vmem:[%s735_s0 + $0x288] sm:$0x3]  ;;  %v102_v20 = vld [vmem:[%s735_s0 + $0x230] sm:$0xff]  ;;  %v27_v21 = vld [vmem:[%s736_s1 + $0x38] sm:$0x1f] }
  0x1d   :  { %219 = vmatpush.msra.mxu3 %v82_v48  ;;  %171 = vmatpush.msra.mxu1 %v52_v54  ;;  %v29_v18 = vld [vmem:[%s736_s1 + $0x48] sm:$0x1f]  ;;  %v114_v23 = vld [vmem:[%s737_s2] sm:$0xff]  ;;  %v99_v25 = vld [vmem:[%s735_s0 + $0x218] sm:$0xff] }
  0x1e   :  { %151 = vmatpush.msra.mxu0 %v33_v51  ;;  %196 = vmatpush.msra.mxu2 %v66_v58  ;;  %v101_v22 = vld [vmem:[%s735_s0 + $0x228] sm:$0xff]  ;;  %v100_v24 = vld [vmem:[%s735_s0 + $0x220] sm:$0xff]  ;;  %v98_v26 = vld [vmem:[%s735_s0 + $0x210] sm:$0xff] }
  0x1f   :  { %220 = vmatpush.msra.mxu3 %v81_v52  ;;  %172 = vmatpush.msra.mxu1 %v51_v59  ;;  %v25_v27 = vld [vmem:[%s736_s1 + $0x28] sm:$0xff]  ;;  %v96_v29 = vld [vmem:[%s735_s0 + $0x200] sm:$0xff]  ;;  %v30_v31 = vld [vmem:[%s736_s1 + $0x50] sm:$0x1f] }
  0x20   :  { %152 = vmatpush.msra.mxu0 %v32_v55  ;;  %197 = vmatpush.msra.mxu2 %v65_v61  ;;  %v97_v28 = vld [vmem:[%s735_s0 + $0x208] sm:$0xff]  ;;  %v24_v30 = vld [vmem:[%s736_s1 + $0x20] sm:$0xff]  ;;  %v31_v32 = vld [vmem:[%s736_s1 + $0x58] sm:$0x1f] }
  0x21   :  { %221 = vmatpush.msra.mxu3 %v80_v56  ;;  %173 = vmatpush.msra.mxu1 %v50_v62 }
  0x22   :  { %229 = vmatpush.msrb.mxu0 %v111_v57  ;;  %198 = vmatpush.msra.mxu2 %v64_v0  ;;  %v295_v0 = vld [vmem:[%s738_s4] sm:$0xff] }
  0x23   :  { %371 = vmatpush.msrb.mxu3 %v111_v57  ;;  %174 = vmatpush.msra.mxu1 %v49_v1 }
  0x24   :  { %230 = vmatpush.msrb.mxu0 %v110_v60  ;;  %199 = vmatmul.f32.vlgmr.msra.gmra.mxu2 %v22_v3 }
  0x25   :  { %372 = vmatpush.msrb.mxu3 %v110_v60  ;;  %153 = vmatmul.f32.vlgmr.msra.gmra.mxu0 %v20_v4 }
  0x26   :  { %231 = vmatpush.msrb.mxu0 %v109_v63  ;;  %222 = vmatmul.f32.vlgmr.msra.gmra.mxu3 %v23_v6 }
  0x27   :  { %373 = vmatpush.msrb.mxu3 %v109_v63  ;;  %175 = vmatpush.msra.mxu1 %v48_v7 }
  0x28   :  { %232 = vmatpush.msrb.mxu0 %v108_v2  ;;  %388 = vset.pattern.permute.xlu0 %v398_v14 }
  0x29   :  { %374 = vmatpush.msrb.mxu3 %v108_v2  ;;  %176 = vmatmul.f32.vlgmr.msra.gmra.mxu1 %v21_v9 }
  0x2a   :  { %233 = vmatpush.msrb.mxu0 %v107_v5  ;;  %123 = vperm.xlu0 %388, %v115_v11  }
  0x2b   :  { %375 = vmatpush.msrb.mxu3 %v107_v5  ;;  %365 = vmatpush.msk.msrb.mxu1 %vm133_vm0, %v113_v12  ;;  %v296_v5 = vld [vmem:[%s738_s4 + $0x8] sm:$0x7] }
  0x2c   :  { %234 = vmatpush.msrb.mxu0 %v106_v8  ;;  %202 = vmatmul.f32.gmra.mxu2 %v28_v15  ;;  %v293_v15 = vld [vmem:[%s739_s3] sm:$0xff] }
  0x2d   :  { %376 = vmatpush.msrb.mxu3 %v106_v8  ;;  %156 = vmatmul.f32.gmra.mxu0 %v26_v16  ;;  %v294_v16 = vld [vmem:[%s739_s3 + $0x8] sm:$0x7] }
  0x2e   :  { %235 = vmatpush.msrb.mxu0 %v105_v10  ;;  %225 = vmatmul.f32.gmra.mxu3 %v29_v18 }
  0x2f   :  { %377 = vmatpush.msrb.mxu3 %v105_v10  ;;  %267 = vmatpush.msrb.mxu1 %v112_v19 }
  0x30   :  { %236 = vmatpush.msrb.mxu0 %v104_v13  ;;  %389 = vset.pattern.permute.xlu1 %v398_v14 }
  0x31   :  { %378 = vmatpush.msrb.mxu3 %v104_v13  ;;  %179 = vmatmul.f32.gmra.mxu1 %v27_v21 }
  0x32   :  { %237 = vmatpush.msrb.mxu0 %v103_v17  ;;  %118 = vperm.xlu0 %388, %v114_v23  }
  0x33   :  { %379 = vmatpush.msrb.mxu3 %v103_v17  ;;  %299 = vperm.xlu1 %389, %v295_v0  }
  0x34   :  { %238 = vmatpush.msrb.mxu0 %v102_v20 }
  0x35   :  { %380 = vmatpush.msrb.mxu3 %v102_v20 }
  0x36   :  { %239 = vmatpush.msrb.mxu0 %v101_v22 }
  0x37   :  { %381 = vmatpush.msrb.mxu3 %v101_v22 }
  0x38   :  { %240 = vmatpush.msrb.mxu0 %v100_v24 }
  0x39   :  { %382 = vmatpush.msrb.mxu3 %v100_v24  ;;  %366 = vmatmul.msk.f32.vlgmr.msrb.gmra.mxu1 %vm126_vm1, %v25_v27 }
  0x3a   :  { %241 = vmatpush.msrb.mxu0 %v99_v25 }
  0x3b   :  { %383 = vmatpush.msrb.mxu3 %v99_v25  ;;  %304 = vperm.xlu1 %389, %v296_v5  }
  0x3c   :  { %242 = vmatpush.msrb.mxu0 %v98_v26 }
  0x3d   :  { %384 = vmatpush.msrb.mxu3 %v98_v26 }
  0x3e   :  { %243 = vmatpush.msrb.mxu0 %v97_v28 }
  0x3f   :  { %385 = vmatpush.msrb.mxu3 %v97_v28 }
  0x40   :  { %244 = vmatpush.msrb.mxu0 %v96_v29 }
  0x41   :  { %386 = vmatpush.msrb.mxu3 %v96_v29  ;;  %245 = vmatmul.f32.vlgmr.msrb.gmra.mxu0 %v24_v30 }
  0x42   :  { %248 = vmatmul.f32.vlgmr.msrb.gmra.mxu3 %v30_v31  ;;  %367 = vmatmul.msk.f32.gmra.mxu1 %vm126_vm1, %v31_v32 }
  0x9c   :  { %v124_v33 = vpop.permute.xlu0 %123 }
  0xa2   :  { %v154_v34 = vpop.f32.mrf.mxu0 }
  0xa4   :  { %v119_v36 = vpop.permute.xlu0 %118 }
  0xa5   :  { %v155_v37 = vadd.f32 %v154_v34, %v119_v36  ;;  %v300_v17 = vpop.permute.xlu1 %299 }
  0xa6   :  { %v177_v35 = vpop.f32.mrf.mxu1 }
  0xa7   :  { %v200_v38 = vpop.f32.mrf.mxu2  ;;  %v178_v42 = vadd.f32 %v177_v35, %v155_v37 }
  0xa9   :  { %v223_v39 = vpop.f32.mrf.mxu3  ;;  %v201_v44 = vadd.f32 %v200_v38, %v178_v42 }
  0xaa   :  { %v157_v41 = vpop.f32.mrf.mxu0 }
  0xab   :  { %v158_v43 = vadd.f32 %v157_v41, %v124_v33  ;;  %v224_v49 = vadd.f32 %v223_v39, %v201_v44 }
  0xad   :  { %v305_v23 = vpop.permute.xlu1 %304 }
  0xae   :  { %v180_v40 = vpop.f32.mrf.mxu1 }
  0xaf   :  { %v181_v46 = vadd.f32 %v180_v40, %v158_v43  ;;  %v203_v47 = vpop.f32.mrf.mxu2 }
  0xb1   :  { %v226_v48 = vpop.f32.mrf.mxu3  ;;  %v204_v51 = vadd.f32 %v203_v47, %v181_v46 }
  0xb3   :  { %v227_v54 = vadd.f32 %v226_v48, %v204_v51 }
  0xb6   :  { %v269_v45 = vpop.f32.mrf.mxu1 }
  0xbe   :  { %v246_v50 = vpop.f32.mrf.mxu0 }
  0xbf   :  { %v247_v52 = vadd.f32 %v246_v50, %v224_v49  ;;  %v272_v57 = vpop.f32.mrf.mxu1 }
  0xc1   :  { %v270_v53 = vadd.f32 %v269_v45, %v247_v52 }
  0xc3   :  { %v277_v55 = vmul.f32 %v270_v53, %v270_v53  ;;  %v275_v13 = vmul.f32 0.5, %v270_v53 }
  0xc5   :  { %v249_v56 = vpop.f32.mrf.mxu3  ;;  %v279_v58 = vmul.f32 %v277_v55, %v270_v53 }
  0xc6   :  { %v250_v59 = vadd.f32 %v249_v56, %v227_v54 }
  0xc7   :  { %v281_v61 = vmul.f32 0.044715, %v279_v58 }
  0xc8   :  { %v273_v60 = vadd.f32 %v272_v57, %v250_v59 }
  0xc9   :  { %v283_v63 = vadd.f32 %v281_v61, %v270_v53 }
  0xca   :  { %v278_v62 = vmul.f32 %v273_v60, %v273_v60  ;;  %v276_v9 = vmul.f32 0.5, %v273_v60 }
  0xcb   :  { %v285_v3 = vmul.f32 0.7978846, %v283_v63 }
  0xcc   :  { %v280_v1 = vmul.f32 %v278_v62, %v273_v60 }
  0xcd   :  { %390 = vtanh.f32 %v285_v3 }
  0xce   :  { %v282_v2 = vmul.f32 0.044715, %v280_v1 }
  0xd0   :  { %v284_v4 = vadd.f32 %v282_v2, %v273_v60 }
  0xd2   :  { %v286_v6 = vmul.f32 0.7978846, %v284_v4 }
  0xd3   :  { %v391_v7 = vpop.eup %390 }
  0xd4   :  { %392 = vtanh.f32 %v286_v6  ;;  %v289_v11 = vadd.f32 1.0, %v391_v7 }
  0xd6   :  { %v291_v14 = vmul.f32 %v289_v11, %v275_v13 }
  0xda   :  { %v393_v8 = vpop.eup %392 }
  0xdb   :  { %v290_v10 = vadd.f32 1.0, %v393_v8 }
  0xdd   :  { %v292_v12 = vmul.f32 %v290_v10, %v276_v9 }
  0xdf   :  { %368 = vmatpush.msk.msrb.mxu2 %vm314_vm2, %v292_v12 }
  0xe1   :  { %333 = vmatpush.msrb.mxu2 %v291_v14 }
  0xe2   :  { %369 = vmatmul.msk.f32.vlgmr.msrb.gmra.mxu2 %vm307_vm3, %v293_v15 }
  0xea   :  { %370 = vmatmul.msk.f32.gmra.mxu2 %vm307_vm3, %v294_v16 }
 0x165   :  { %v335_v18 = vpop.f32.mrf.mxu2 }
 0x166   :  { %v336_v19 = vadd.f32 %v335_v18, %v300_v17 }
 0x168   :  { %v343_v20 = vmul.f32 %v336_v19, %v336_v19  ;;  %v341_v34 = vmul.f32 0.5, %v336_v19 }
 0x16a   :  { %v345_v21 = vmul.f32 %v343_v20, %v336_v19 }
 0x16c   :  { %v347_v22 = vmul.f32 0.044715, %v345_v21 }
 0x16d   :  { %v338_v24 = vpop.f32.mrf.mxu2 }
 0x16e   :  { %v349_v25 = vadd.f32 %v347_v22, %v336_v19  ;;  %v339_v26 = vadd.f32 %v338_v24, %v305_v23 }
 0x170   :  { %v351_v27 = vmul.f32 0.7978846, %v349_v25  ;;  %v344_v28 = vmul.f32 %v339_v26, %v339_v26  ;;  %v342_v38 = vmul.f32 0.5, %v339_v26 }
 0x172   :  { %394 = vtanh.f32 %v351_v27  ;;  %v346_v29 = vmul.f32 %v344_v28, %v339_v26 }
 0x174   :  { %v348_v30 = vmul.f32 0.044715, %v346_v29 }
 0x176   :  { %v350_v31 = vadd.f32 %v348_v30, %v339_v26 }
 0x178   :  { %v395_v32 = vpop.eup %394  ;;  %v352_v33 = vmul.f32 0.7978846, %v350_v31 }
 0x179   :  { %v355_v35 = vadd.f32 1.0, %v395_v32 }
 0x17a   :  { %396 = vtanh.f32 %v352_v33 }
 0x17b   :  { %v357_v36 = vmul.f32 %v355_v35, %v341_v34 }
 0x17d   :  { %359 = vst [vmem:[%s740_s5] sm:$0xff] %v357_v36 }
 0x180   :  { %v397_v37 = vpop.eup %396 }
 0x181   :  { %v356_v39 = vadd.f32 1.0, %v397_v37 }
 0x183   :  { %v358_v40 = vmul.f32 %v356_v39, %v342_v38 }
 0x185   :  { %360 = vst [vmem:[%s740_s5 + $0x8] sm:$0x7] %v358_v40 }

</bundles_post_ra>
